<compile_context>
chip_gen: v5e
topology: v5e:2x2
jax: 0.10.0
libtpu: 0.0.40
codegen_flags: <defaults>
</compile_context>

<pallas_src>
import functools

import jax
import jax.numpy as jnp
from jax.experimental import pallas as pl
from jax.experimental.pallas import tpu as pltpu


def _round_up(x, m):
    return (x + m - 1) // m * m


def cnnblock_kernel(xm_ref, xh_ref, w_ref, shift_ref, o_ref, *, ksize, stride, TL):
    """One (batch, L-tile) step: out = relu(sum_k W_k @ x[:, k::stride] + shift)."""
    # Main tile + halo, concatenated along lanes (both widths are 128-multiples).
    x_full = jnp.concatenate([xm_ref[0], xh_ref[0]], axis=-1)   # [C_in_p, TL*stride + HW] bf16
    cin = x_full.shape[0]

    def tap(k):
        if stride == 1:
            return x_full[:, k:k + TL]
        return jax.lax.slice(x_full, (0, k), (cin, k + (TL - 1) * stride + 1),
                             (1, stride))

    acc = jnp.dot(w_ref[0], tap(0), preferred_element_type=jnp.float32)
    for k in range(1, ksize):
        acc = acc + jnp.dot(w_ref[k], tap(k), preferred_element_type=jnp.float32)

    y = acc + shift_ref[...]                                    # + [C_out_p, 1] broadcast
    o_ref[0] = jnp.maximum(y, 0.0).astype(o_ref.dtype)          # ReLU, lane-dense store


@functools.partial(jax.jit, static_argnames=("ksize", "stride", "padding", "eps"))
def cnn_block_forward(x, conv_w, conv_b, gamma, beta, run_mean, run_var,
                      *, ksize, stride, padding, eps=1e-5):
    B, C_in, L = x.shape
    C_out = conv_w.shape[0]
    L_out = (L + 2 * padding - ksize) // stride + 1

    C_in_p = _round_up(C_in, 8)
    C_out_p = _round_up(C_out, 8)

    # Output lane tile.  Cap at 2048; when B == 1 force >= 2 grid steps so both
    # v7x TensorCores get work (v5e/v6e have 1 TC and are unaffected).
    TL = min(2048, _round_up(L_out, 128))
    if B == 1 and L_out > 128:
        TL = min(TL, _round_up(pl.cdiv(L_out, 2), 128))
    NT = pl.cdiv(L_out, TL)
    L_p = NT * TL

    # Halo block width (covers the ksize-1 extra taps past the main tile).
    HW = _round_up(max(ksize - stride, 1), 128)
    while (TL * stride) % HW != 0:      # keep halo block offsets expressible
        HW += 128

    # Padded input: conv left-padding applied, right side zero-padded so every
    # (main + halo) tile window is in-bounds.  Single 1x copy of x, in bf16.
    LX = _round_up(max(NT * TL * stride + HW, L + 2 * padding), 128)
    x_pad = jnp.zeros((B, C_in_p, LX), jnp.bfloat16)
    x_pad = x_pad.at[:, :C_in, padding:padding + L].set(x.astype(jnp.bfloat16))

    # Fold conv bias + BatchNorm (eval) into weights + per-channel shift.
    inv_std = 1.0 / jnp.sqrt(run_var + eps)
    scale = gamma * inv_std                                   # [C_out]
    shift = beta + (conv_b - run_mean) * scale                # [C_out]
    w_scaled = conv_w * scale[:, None, None]                  # [C_out, C_in, ksize]
    w_k = jnp.transpose(w_scaled, (2, 0, 1))                  # [ksize, C_out, C_in]
    w_k = jnp.pad(w_k, ((0, 0), (0, C_out_p - C_out), (0, C_in_p - C_in)))
    w_k = w_k.astype(jnp.bfloat16)                            # resident, bf16 MXU path
    shift_p = jnp.pad(shift, (0, C_out_p - C_out)).reshape(C_out_p, 1)  # f32

    grid = (B, NT)

    # True (unpadded) costs for XLA's scheduler.
    flops = 2 * B * L_out * C_in * ksize * C_out
    bytes_accessed = (B * C_in * L * 2 + conv_w.size * 2 + C_out * 4
                      + B * C_out * L_out * 4)

    # Per-step VMEM budget (double-buffered x / out tiles + resident weights).
    # v7x has 64 MiB VMEM per TensorCore -> keep the scoped limit <= 48 MiB.
    step_bytes = (2 * (C_in_p * TL * stride + C_in_p * HW) * 2
                  + 2 * C_out_p * TL * 4
                  + w_k.size * 2 + C_out_p * 4)
    vmem_limit = int(min(48 * 1024 * 1024, max(32 * 1024 * 1024, 4 * step_bytes)))

    out_p = pl.pallas_call(
        functools.partial(cnnblock_kernel, ksize=ksize, stride=stride, TL=TL),
        out_shape=jax.ShapeDtypeStruct((B, C_out_p, L_p), jnp.float32),
        grid_spec=pltpu.PrefetchScalarGridSpec(
            num_scalar_prefetch=0,
            grid=grid,
            in_specs=[
                # main x tile (fused im2col source)
                pl.BlockSpec((1, C_in_p, TL * stride), lambda b, l: (b, 0, l)),
                # halo: first HW lanes past the main tile (same padded x array)
                pl.BlockSpec((1, C_in_p, HW),
                             lambda b, l: (b, 0, (l + 1) * (TL * stride // HW))),
                # resident BN-scaled weights [ksize, C_out_p, C_in_p]
                pl.BlockSpec((ksize, C_out_p, C_in_p), lambda b, l: (0, 0, 0)),
                # resident bias/BN shift
                pl.BlockSpec((C_out_p, 1), lambda b, l: (0, 0)),
            ],
            out_specs=pl.BlockSpec((1, C_out_p, TL), lambda b, l: (b, 0, l)),
        ),
        compiler_params=pltpu.CompilerParams(
            dimension_semantics=("parallel", "parallel"),
            vmem_limit_bytes=vmem_limit,
        ),
        cost_estimate=pl.CostEstimate(
            flops=flops, transcendentals=0, bytes_accessed=bytes_accessed),
    )(x_pad, x_pad, w_k, shift_p)

    # Output is already NCL; drop channel / spatial padding only if present.
    if C_out_p == C_out and L_p == L_out:
        return out_p
    return out_p[:, :C_out, :L_out]


def reference_forward(x, conv_w, conv_b, gamma, beta, run_mean, run_var,
                      *, ksize, stride, padding, eps=1e-5):
    """Pure-JAX f32 reference (lax conv) for correctness checking."""
    y = jax.lax.conv_general_dilated(
        x, conv_w, window_strides=(stride,), padding=[(padding, padding)],
        dimension_numbers=("NCH", "OIH", "NCH"))
    y = y + conv_b[None, :, None]
    y = (y - run_mean[None, :, None]) / jnp.sqrt(run_var[None, :, None] + eps)
    y = y * gamma[None, :, None] + beta[None, :, None]
    return jnp.maximum(y, 0.0)


if __name__ == "__main__":
    # Small shapes: batch=2, input_channels=4, length=16, output_channels=8,
    # kernel_size=3, stride=1, padding=1  -> output [2, 8, 16]
    B, C_in, L = 2, 4, 16
    C_out, ksize, stride, padding = 8, 3, 1, 1

    key = jax.random.PRNGKey(0)
    kx, kw, kb, kg, kbe = jax.random.split(key, 5)

    x = jax.random.normal(kx, (B, C_in, L), dtype=jnp.float32)
    conv_w = 0.1 * jax.random.normal(kw, (C_out, C_in, ksize), dtype=jnp.float32)
    conv_b = 0.1 * jax.random.normal(kb, (C_out,), dtype=jnp.float32)
    gamma = 1.0 + 0.05 * jax.random.normal(kg, (C_out,), dtype=jnp.float32)
    beta = 0.05 * jax.random.normal(kbe, (C_out,), dtype=jnp.float32)
    run_mean = jnp.zeros((C_out,), jnp.float32)
    run_var = jnp.ones((C_out,), jnp.float32)

    out = cnn_block_forward(x, conv_w, conv_b, gamma, beta, run_mean, run_var,
                            ksize=ksize, stride=stride, padding=padding)
    out = jax.block_until_ready(out)

    ref = reference_forward(x, conv_w, conv_b, gamma, beta, run_mean, run_var,
                            ksize=ksize, stride=stride, padding=padding)
    assert out.shape == (B, C_out, L), out.shape
    # bf16 matmul operands vs f32 reference -> loosened tolerance.
    assert jnp.allclose(out, ref, atol=1e-2, rtol=1e-2), "mismatch vs reference"

    print("KERNEL_OK")
</pallas_src>

<mosaic_0001>
module attributes {stable_mosaic.version = 11 : i64} {
  func.func @cnnblock_kernel(%arg0: i32, %arg1: i32, %arg2: memref<1x8x128xbf16, #tpu.memory_space<vmem>>, %arg3: memref<1x8x128xbf16, #tpu.memory_space<vmem>>, %arg4: memref<3x8x8xbf16, #tpu.memory_space<vmem>>, %arg5: memref<8x1xf32, #tpu.memory_space<vmem>>, %arg6: memref<1x8x128xf32, #tpu.memory_space<vmem>>) attributes {dimension_semantics = [#tpu.dimension_semantics<parallel>, #tpu.dimension_semantics<parallel>], iteration_bounds = array<i64: 2, 1>, scalar_prefetch = 0 : i64, scratch_operands = 0 : i64, tpu.core_type = #tpu.core_type<tc>, window_params = [{transform_indices = @transform_0, window_bounds = array<i64: 1, 8, 128>}, {transform_indices = @transform_1, window_bounds = array<i64: 1, 8, 128>}, {pipeline_mode = #tpu.pipeline_mode<synchronous>, transform_indices = @transform_2, window_bounds = array<i64: 3, 8, 8>}, {pipeline_mode = #tpu.pipeline_mode<synchronous>, transform_indices = @transform_3, window_bounds = array<i64: 8, 1>}, {transform_indices = @transform_4, window_bounds = array<i64: 1, 8, 128>}]} {
    %c0 = arith.constant 0 : index
    %c0_0 = arith.constant 0 : index
    %c0_1 = arith.constant 0 : index
    %0 = vector.load %arg2[%c0, %c0_0, %c0_1] : memref<1x8x128xbf16, #tpu.memory_space<vmem>>, vector<1x8x128xbf16>
    %1 = vector.shape_cast %0 : vector<1x8x128xbf16> to vector<8x128xbf16>
    %c0_2 = arith.constant 0 : index
    %c0_3 = arith.constant 0 : index
    %c0_4 = arith.constant 0 : index
    %2 = vector.load %arg3[%c0_2, %c0_3, %c0_4] : memref<1x8x128xbf16, #tpu.memory_space<vmem>>, vector<1x8x128xbf16>
    %3 = vector.shape_cast %2 : vector<1x8x128xbf16> to vector<8x128xbf16>
    %4 = tpu.concatenate %1, %3 in 1 : vector<8x128xbf16>, vector<8x128xbf16> -> vector<8x256xbf16>
    %c0_5 = arith.constant 0 : index
    %c0_6 = arith.constant 0 : index
    %c0_7 = arith.constant 0 : index
    %5 = vector.load %arg4[%c0_5, %c0_6, %c0_7] : memref<3x8x8xbf16, #tpu.memory_space<vmem>>, vector<1x8x8xbf16>
    %6 = vector.shape_cast %5 : vector<1x8x8xbf16> to vector<8x8xbf16>
    %7 = vector.extract_strided_slice %4 {offsets = [0, 0], sizes = [8, 128], strides = [1, 1]} : vector<8x256xbf16> to vector<8x128xbf16>
    %cst = arith.constant dense<0.000000e+00> : vector<8x128xf32>
    %8 = tpu.matmul %6, %7, %cst {dimension_numbers = #tpu.dot_dimension_numbers<[1], [0], [0], [1], [0, 0, 1, 1], [], []>} : vector<8x8xbf16>, vector<8x128xbf16>, vector<8x128xf32> -> vector<8x128xf32>
    %c1 = arith.constant 1 : index
    %c0_8 = arith.constant 0 : index
    %c0_9 = arith.constant 0 : index
    %9 = vector.load %arg4[%c1, %c0_8, %c0_9] : memref<3x8x8xbf16, #tpu.memory_space<vmem>>, vector<1x8x8xbf16>
    %10 = vector.shape_cast %9 : vector<1x8x8xbf16> to vector<8x8xbf16>
    %11 = vector.extract_strided_slice %4 {offsets = [0, 1], sizes = [8, 128], strides = [1, 1]} : vector<8x256xbf16> to vector<8x128xbf16>
    %cst_10 = arith.constant dense<0.000000e+00> : vector<8x128xf32>
    %12 = tpu.matmul %10, %11, %cst_10 {dimension_numbers = #tpu.dot_dimension_numbers<[1], [0], [0], [1], [0, 0, 1, 1], [], []>} : vector<8x8xbf16>, vector<8x128xbf16>, vector<8x128xf32> -> vector<8x128xf32>
    %13 = arith.addf %8, %12 : vector<8x128xf32>
    %c2 = arith.constant 2 : index
    %c0_11 = arith.constant 0 : index
    %c0_12 = arith.constant 0 : index
    %14 = vector.load %arg4[%c2, %c0_11, %c0_12] : memref<3x8x8xbf16, #tpu.memory_space<vmem>>, vector<1x8x8xbf16>
    %15 = vector.shape_cast %14 : vector<1x8x8xbf16> to vector<8x8xbf16>
    %16 = vector.extract_strided_slice %4 {offsets = [0, 2], sizes = [8, 128], strides = [1, 1]} : vector<8x256xbf16> to vector<8x128xbf16>
    %cst_13 = arith.constant dense<0.000000e+00> : vector<8x128xf32>
    %17 = tpu.matmul %15, %16, %cst_13 {dimension_numbers = #tpu.dot_dimension_numbers<[1], [0], [0], [1], [0, 0, 1, 1], [], []>} : vector<8x8xbf16>, vector<8x128xbf16>, vector<8x128xf32> -> vector<8x128xf32>
    %18 = arith.addf %13, %17 : vector<8x128xf32>
    %c0_14 = arith.constant 0 : index
    %c0_15 = arith.constant 0 : index
    %19 = vector.load %arg5[%c0_14, %c0_15] : memref<8x1xf32, #tpu.memory_space<vmem>>, vector<8x1xf32>
    %20 = vector.broadcast %19 : vector<8x1xf32> to vector<8x128xf32>
    %21 = arith.addf %18, %20 : vector<8x128xf32>
    %cst_16 = arith.constant 0.000000e+00 : f32
    %22 = vector.broadcast %cst_16 : f32 to vector<8x128xf32>
    %23 = arith.maximumf %21, %22 : vector<8x128xf32>
    %c0_17 = arith.constant 0 : index
    %c0_18 = arith.constant 0 : index
    %c0_19 = arith.constant 0 : index
    %24 = vector.load %arg6[%c0_17, %c0_18, %c0_19] : memref<1x8x128xf32, #tpu.memory_space<vmem>>, vector<1x8x128xf32>
    %25 = vector.shape_cast %24 : vector<1x8x128xf32> to vector<8x128xf32>
    %26 = vector.shape_cast %23 : vector<8x128xf32> to vector<1x8x128xf32>
    tpu.vector_store %arg6[%c0_17, %c0_18, %c0_19], %26 {strides = array<i32>} : memref<1x8x128xf32, #tpu.memory_space<vmem>>, vector<1x8x128xf32>,
    return
  }
  func.func @transform_0(%arg0: i32, %arg1: i32) -> (i32, i32, i32) {
    %c0_i32 = arith.constant 0 : i32
    %c0_i32_0 = arith.constant 0 : i32
    return %arg0, %c0_i32, %arg1 : i32, i32, i32
  }
  func.func @transform_1(%arg0: i32, %arg1: i32) -> (i32, i32, i32) {
    %c1_i32 = arith.constant 1 : i32
    %0 = arith.addi %arg1, %c1_i32 : i32
    %c1_i32_0 = arith.constant 1 : i32
    %1 = arith.muli %0, %c1_i32_0 : i32
    %c0_i32 = arith.constant 0 : i32
    %c0_i32_1 = arith.constant 0 : i32
    return %arg0, %c0_i32, %1 : i32, i32, i32
  }
  func.func @transform_2(%arg0: i32, %arg1: i32) -> (i32, i32, i32) {
    %c0_i32 = arith.constant 0 : i32
    %c0_i32_0 = arith.constant 0 : i32
    %c0_i32_1 = arith.constant 0 : i32
    %c0_i32_2 = arith.constant 0 : i32
    return %c0_i32, %c0_i32_0, %c0_i32_1 : i32, i32, i32
  }
  func.func @transform_3(%arg0: i32, %arg1: i32) -> (i32, i32) {
    %c0_i32 = arith.constant 0 : i32
    %c0_i32_0 = arith.constant 0 : i32
    %c0_i32_1 = arith.constant 0 : i32
    return %c0_i32, %c0_i32_0 : i32, i32
  }
  func.func @transform_4(%arg0: i32, %arg1: i32) -> (i32, i32, i32) {
    %c0_i32 = arith.constant 0 : i32
    %c0_i32_0 = arith.constant 0 : i32
    return %arg0, %c0_i32, %arg1 : i32, i32, i32
  }
}

</mosaic_0001>

<bundles_post_ra>
// kernel: cnn_block_forward.1
= control target key start
LH: loop header
LB: loop body
LE: loop exit
PB: predicated region body
PF: predicated region fallthrough
CT: control target
= control target key end

     0   :  { %9 = vsyncpa [#allocation3], 0  ;;  %s768_s0 = inlined_call_operand.vmem [shape: bf16[2,8,256], index: 0, kind: input, shape index: {}, may-alias: {0,1}]   ;;  %s769_s1 = inlined_call_operand.vmem [shape: bf16[2,8,256], index: 1, kind: input, shape index: {}, may-alias: {0,1}]   ;;  %s770_s2 = inlined_call_operand.vmem [shape: bf16[3,8,8], index: 2, kind: input, shape index: {}]   ;;  %s771_s3 = inlined_call_operand.vmem [shape: f32[8,1], index: 3, kind: input, shape index: {}]   ;;  %s772_s4 = inlined_call_operand.hbm [shape: f32[2,8,128], index: 4, kind: output, shape index: {}]  }
   0x1   :  { %11 = vsyncpa [#allocation3 + $0x1], 0  ;;  %s650_s15 = smov 0   ;;  %s652_s16 = smov 0  }
   0x2   :  { %s654_s17 = smov 0   ;;  %s656_s18 = smov 0  }
   0x3   :  { %s658_s19 = smov 0   ;;  %s660_s20 = smov 0  }
   0x4 LB: > { %s459_s21 = sadd.s32 4294967295, %s620_s20   ;;  %s460_s22 = sadd.s32 4294967294, %s620_s20   ;;  %s620_s20 = sphi %s660_s20, %s17_s20   ;;  %s616_s19 = sphi %s658_s19, %s779_s19   ;;  %s612_s18 = sphi %s656_s18, %s778_s18   ;;  %s608_s17 = sphi %s654_s17, %s777_s17   ;;  %s604_s16 = sphi %s652_s16, %s776_s16   ;;  %s600_s15 = sphi %s650_s15, %s775_s15  }
   0x5   : > { %s29_s23 = sadd.s32 1, %s616_s19  ;;  %s138_s24 = sadd.s32 1, %s608_s17 }
   0x6   : > { %p31_p0 = scmp.ge.s32.totalorder %s29_s23, 2  ;;  %p148_p1 = scmp.ne.s32.totalorder %s608_s17, %s604_s16 }
   0x7   : > { %p149_p2 = scmp.eq.s32.totalorder %s459_s21, 1  ;;  %p154_p3 = scmp.ne.s32.totalorder %s604_s16, %s600_s15 }
   0x8   : > { %s781_s23 = smov (%p31_p0, %s29_s23), 0  ;;  %p155_p5 = scmp.eq.s32.totalorder %s460_s22, 1 }
   0x9   : > { %p690_p4 = por %p149_p2, %p148_p1  ;;  %s133_s26 = ssub.s32 %s616_s19, %s781_s23 }
   0xa   : > { %p463_p6 = scmp.ge.s32.totalorder %s620_s20, 1  ;;  %p136_p7 = scmp.eq.s32.totalorder %s133_s26, 0 }
   0xb   : > { %p697_p8 = por %p155_p5, %p154_p3  ;;  %p203_p9 = scmp.lt.s32.totalorder %s620_s20, 3 }
   0xc   : > { %s703_s28 = scalar_select %p136_p7, %s608_s17, %s138_s24  }
   0xd   : > { %p204_p10 = pnand %p463_p6, %p203_p9 }
   0xe   : > { %p241_p11 = scmp.lt.s32.totalorder (!%p204_p10), %s612_s18, 1  ;;  %s622_s9 = smov (!%p204_p10), 127  }
   0xf   : > { %207 = sbr.rel (%p204_p10) target bundleno = 295 (0x127), region = 36  ;;  %s623_s10 = smov (!%p204_p10), 126  }
  0x10   : > { %s238_s6 = sand.u32 (!%p204_p10), 1, %s604_s16  }
  0x14   : > { %s242_s29 = scalar_select %p241_p11, %s612_s18, 1  ;;  %vm277_vm0 = vcmask 1043456   ;;  %v262_v3 = vld [vmem:[%s770_s2] sm:$0xf]  ;;  %vm273_vm1 = vcmask 64512   ;;  %v624_v5 = vmov 0  }
  0x15   : > { %v341_v4 = vld [vmem:[%s771_s3] sm:$0xff]  ;;  %540 = vset.pattern.permute.xlu2 %v624_v5  ;;  %541 = vset.pattern.permute.xlu0 %v624_v5  ;;  %vm271_vm2 = vcmask 1039360   ;;  %vm319_vm3 = vcmask 1031168   ;;  %v472_v15 = vld [vmem:[%s770_s2 + $0x8] sm:$0xf] }
  0x16   : > { %s478_s30 = sshll.u32 %s242_s29, 3  ;;  %344 = vperm.xlu2 %540, %v341_v4   ;;  %v469_v14 = vld [vmem:[%s770_s2 + $0x4] sm:$0xf]  ;;  %s562_s29 = scalar_lea.hbm %s772_s4, 16 }
  0x17   : > { %s248_s7 = scalar_lea.vmem %s768_s0, %s478_s30  ;;  %s480_s8 = sadd.s32 4, %s478_s30 }
  0x18   : > { %v260_v0 = vld [vmem:[%s248_s7] sm:$0xf]  ;;  %s257_s13 = scalar_lea.vmem %s769_s1, %s480_s8  ;;  %s464_s7 = sshll.u32 %s238_s6, 3 }
  0x19   : > { %267 = vrot.lane.b32.xlu1 %v260_v0, %s622_s9  ;;  %315 = vrot.lane.b32.xlu0 %v260_v0, %s623_s10  ;;  %v261_v1 = vld [vmem:[%s257_s13] sm:$0xf]  ;;  %v298_v2 = vsel %vm277_vm0, %v260_v0, 0  ;;  %s475_s8 = sshll.u32 %s612_s18, 3  ;;  %s240_s12 = scalar_lea.vmem [#allocation2], %s464_s7 }
  0x1a   : > { %307 = vmatpush.bf16.msra.mxu1 %v298_v2  ;;  %s362_s11 = scalar_lea.hbm %s772_s4, %s475_s8  ;;  %s364_s13 = sshll.u32 %s240_s12, 4  ;;  %s365_s13 = int_to_ptr.vmem [resolvable:$true] %s364_s13 }
  0x1b   : > { %s366_s14 = sshll.u32 %s362_s11, 4  ;;  %s351_s18 = scalar_lea.sflag [#allocation3], %s238_s6  ;;  %s367_s14 = int_to_ptr.hbm [resolvable:$true] %s366_s14 }
  0x1c   : > { %s556_s21 = sshra.s32 %s367_s14, 4  ;;  %s557_s21 = int_to_ptr.hbm [resolvable:$true] %s556_s21 }
  0x1d   : > { %471 = vmatmul.msk.bf16.vlgmr.msra.gmra.mxu1 %vm273_vm1, %v262_v3  ;;  %s558_s22 = scalar_lea.hbm %s557_s21, 8  ;;  %p563_p1 = scmp.lt.s32.totalorder %s557_s21, %s772_s4 }
  0x1e   : > { %p559_p12 = scmp.ne.s32.totalorder %s557_s21, %s558_s22  ;;  %p564_p2 = scmp.lt.s32.totalorder %s562_s29, %s558_s22 }
  0x20   : > { %p560_p13 = pnand %p559_p12, %p690_p4  ;;  %p565_p3 = por %p564_p2, %p563_p1 }
  0x21   : > { %269 = vrot.lane.b32.xlu1 %v261_v1, %s622_s9  ;;  %317 = vrot.lane.b32.xlu0 %v261_v1, %s623_s10 }
  0x22   : > { %p561_p0 = pneg %p560_p13 }
  0x24   : > { %p566_p5 = pnand %p565_p3, %p561_p0 }
  0x70   : > { %v345_v21 = vpop.permute.xlu2 %344 }
  0x8b   : > { %v268_v6 = vpop.permute.xlu1 %267  ;;  %v316_v7 = vpop.permute.xlu0 %315 }
  0x93   : > { %v270_v8 = vpop.permute.xlu1 %269  ;;  %v318_v9 = vpop.permute.xlu0 %317 }
  0x94   : > { %v272_v10 = vsel %vm271_vm2, %v268_v6, %v270_v8  ;;  %v320_v11 = vsel %vm319_vm3, %v316_v7, %v318_v9 }
  0x95   : > { %v279_v12 = vsel %vm277_vm0, %v272_v10, 0  ;;  %v325_v13 = vsel %vm277_vm0, %v320_v11, 0 }
  0x96   : > { %288 = vmatpush.bf16.msra.mxu0 %v279_v12  ;;  %334 = vmatpush.bf16.msra.mxu2 %v325_v13 }
  0x99   : > { %470 = vmatmul.msk.bf16.vlgmr.msra.gmra.mxu0 %vm273_vm1, %v469_v14  ;;  %473 = vmatmul.msk.bf16.vlgmr.msra.gmra.mxu2 %vm273_vm1, %v472_v15 }
  0x9a   : > { %v309_v16 = vpop.f32.mrf.mxu1 }
  0xa2   : > { %v311_v17 = vpop.f32.mrf.mxu1 }
 0x116   : > { %v290_v18 = vpop.f32.mrf.mxu0 }
 0x117   : > { %v310_v19 = vadd.f32 %v309_v16, %v290_v18 }
 0x11c   : > { %v336_v20 = vpop.f32.mrf.mxu2 }
 0x11d   : > { %v340_v22 = vadd.f32 %v336_v20, %v310_v19 }
 0x11e   : > { %v292_v23 = vpop.f32.mrf.mxu0 }
 0x11f   : > { %v347_v24 = vadd.f32 %v345_v21, %v340_v22 }
 0x121   : > { %v348_v25 = vmax.f32 %v347_v24, 0.0 }
 0x123   : > { %349 = vst [vmem:[%s240_s12] sm:$0xff] %v348_v25 }
 0x124   : > { %v338_v26 = vpop.f32.mrf.mxu2 }
 0x125   : > { %569 = shalt.err (!%p566_p5)
}
 0x126   : > { %482 = dma.vmem_to_hbm [thread:$0]  (%p690_p4), %s365_s13, 128, %s367_s14, %s351_s18  }
 0x127 PF: > { %p488_p6 = scmp.ge.s32.totalorder %s620_s20, 2  ;;  %s378_s6 = sand.u32 1, %s600_s15  }
 0x128   : > { %s379_s7 = scalar_lea.sflag [#allocation3], %s378_s6 }
 0x129   : > { %p485_p7 = pnand %p488_p6, %p697_p8 }
 0x12b   : > { %p486_p9 = pneg %p485_p7 }
 0x12d   : > { %595 = dma.done.wait (%p486_p9), %s379_s7, 128  }
 0x12e   : > { %597 = vsyncadd (%p486_p9), %s379_s7, 4294967168  ;;  %s17_s20 = sadd.s32 1, %s620_s20   ;;  %s775_s15 = smov %s604_s16 }
 0x12f   : > { %p14_p10 = scmp.ge.s32.totalorder %s17_s20, 4   ;;  %s776_s16 = smov %s608_s17 }
 0x130   : > { %s777_s17 = smov %s703_s28  ;;  %s778_s18 = smov %s616_s19 }
 0x131   : > { %s779_s19 = smov %s781_s23  ;;  %16 = sbr.rel (!%p14_p10) target bundleno = 4 (0x4), region = 76 }
 0x136   :  { %385 = vsyncpa [#allocation3], 1 }
 0x137   :  { %387 = vsyncpa [#allocation3 + $0x1], 1 }

</bundles_post_ra>
